<compile_context>
chip_gen: v6e
topology: v6e:2x2x1
jax: 0.10.0
libtpu: 0.0.40
codegen_flags: <defaults>
</compile_context>

<pallas_src>
import functools

import jax
import jax.numpy as jnp
from jax.experimental import pallas as pl


# ---------------------------------------------------------------------------
# Pallas kernel: fused conv3x3 (im2col matmul) + maxpool2x2 + folded-BN + ReLU
# ---------------------------------------------------------------------------
def _conv_pool_bn_relu_kernel(p_ref, w_ref, s_ref, b_ref, o_ref, *, m):
    """p_ref: (Kp, 4*m)  bf16  transposed im2col patches; lane index is
              phase*m + (b*Hp*Wp + ho*Wp + wo), phase = 2x2 pool-window corner,
              so the four corners are contiguous 128-aligned lane blocks.
       w_ref: (Cout, Kp) bf16  transposed conv weights, K ordered (ky, kx, ci), zero-padded.
       s_ref: (Cout, m)  f32   lane-dense folded BN scale  = gamma / sqrt(var + eps)
       b_ref: (Cout, m)  f32   lane-dense folded bias      = beta + (conv_bias - mean)*scale
       o_ref: (Cout, m)  f32   pooled output, channel-major (maps straight to NCHW).
    """
    # One MXU matmul (K = Kp) with f32 accumulation.
    z = jnp.dot(w_ref[...], p_ref[...], preferred_element_type=jnp.float32)   # (Cout, 4*m)
    # MaxPool2d(2, 2): max over the four contiguous, 128-aligned phase blocks.
    pooled = jnp.maximum(jnp.maximum(z[:, 0:m], z[:, m:2 * m]),
                         jnp.maximum(z[:, 2 * m:3 * m], z[:, 3 * m:4 * m]))    # (Cout, m)
    # Eval-mode BatchNorm (lane-dense per-channel affine) + ReLU; pure f32 VPU epilogue.
    o_ref[...] = jnp.maximum(pooled * s_ref[...] + b_ref[...], 0.0).astype(o_ref.dtype)


# ---------------------------------------------------------------------------
# Wrapper: minimal XLA-side layout plumbing + one gridless pallas_call
# ---------------------------------------------------------------------------
def single_conv_pool(x_nchw, params):
    w_t, scale, bias = params              # w_t: (Cout, Kp) bf16; scale/bias: (Cout, 1) f32
    B, Cin, H, W = x_nchw.shape
    Cout, Kp = w_t.shape
    K = 9 * Cin
    Hp, Wp = H // 2, W // 2                # floor, matches MaxPool2d(2, 2)
    m = B * Hp * Wp
    m_pad = ((m + 127) // 128) * 128       # lane-dense invariant: pixel axis multiple of 128

    # Cast ONCE to the MXU operand dtype, then zero-pad for Conv2d(padding=1).
    xb = x_nchw.astype(w_t.dtype)
    x_pad = jnp.pad(xb, ((0, 0), (0, 0), (1, 1), (1, 1)))

    # Pool-phase-major im2col: 9 static tap slices + one reshape/transpose.
    #   patches[(ky*3+kx)*Cin + ci, (2*dy+dx)*m + b*Hp*Wp + ho*Wp + wo]
    #     = x_pad[b, ci, 2*ho + dy + ky, 2*wo + dx + kx]
    H2, W2 = 2 * Hp, 2 * Wp
    taps = jnp.stack([x_pad[:, :, ky:ky + H2, kx:kx + W2]
                      for ky in range(3) for kx in range(3)], axis=0)        # (9,B,Cin,H2,W2)
    taps = taps.reshape(9, B, Cin, Hp, 2, Wp, 2)
    patches = jnp.transpose(taps, (0, 2, 4, 6, 1, 3, 5)).reshape(K, 4, m)    # (K, phase, m)
    if Kp != K or m_pad != m:
        patches = jnp.pad(patches, ((0, Kp - K), (0, 0), (0, m_pad - m)))
    patches_t = patches.reshape(Kp, 4 * m_pad)                               # (Kp, 4*m_pad)

    # Lane-dense epilogue operands (no (Cout,1) masked loads / in-kernel broadcast).
    s_dense = jnp.broadcast_to(scale, (Cout, m_pad)).astype(jnp.float32)
    b_dense = jnp.broadcast_to(bias, (Cout, m_pad)).astype(jnp.float32)

    cost = pl.CostEstimate(
        flops=2 * Cout * Kp * 4 * m_pad,
        transcendentals=0,
        bytes_accessed=(patches_t.size * 2 + w_t.size * 2
                        + 2 * Cout * m_pad * 4 + Cout * m_pad * 4))

    # Whole problem fits VMEM at these sizes -> single block, no grid (grid = pure overhead).
    # TODO(synk): for large H*W/B, tile the pixel/lane axis with a grid + BlockSpec and mark
    #   it "parallel" (uses v7x's 2 TensorCores); size lane blocks for ~32 MiB scoped VMEM on
    #   v7x (64 MiB physical; the f32 pre-pool z is 4x the output tile) and 2-4x larger
    #   blocks on v6e via pltpu.CompilerParams(vmem_limit_bytes=...).
    out = pl.pallas_call(
        functools.partial(_conv_pool_bn_relu_kernel, m=m_pad),
        out_shape=jax.ShapeDtypeStruct((Cout, m_pad), jnp.float32),
        cost_estimate=cost,
    )(patches_t, w_t, s_dense, b_dense)

    if m_pad != m:
        out = out[:, :m]
    # (Cout, B*Hp*Wp) -> NCHW (tiny reshape/transpose of a lane-dense slab).
    return jnp.transpose(out.reshape(Cout, B, Hp, Wp), (1, 0, 2, 3))


# ---------------------------------------------------------------------------
# Deterministic parameter init (shapes mirror the PyTorch module's __init__)
# ---------------------------------------------------------------------------
def init_params(key, cin, cout, *, compute_dtype=jnp.bfloat16):
    k1, k2 = jax.random.split(key)
    w = jax.random.normal(k1, (cout, cin, 3, 3), jnp.float32) * (1.0 / jnp.sqrt(cin * 9.0))
    b = jax.random.normal(k2, (cout,), jnp.float32) * 0.01
    # BatchNorm2d eval-mode stats at init: gamma=1, beta=0, running_mean=0, running_var=1.
    # TODO(synk): train-mode BatchNorm (batch statistics) not implemented; eval semantics only.
    gamma = jnp.ones((cout,), jnp.float32)
    beta = jnp.zeros((cout,), jnp.float32)
    rmean = jnp.zeros((cout,), jnp.float32)
    rvar = jnp.ones((cout,), jnp.float32)
    eps = 1e-5
    scale = gamma / jnp.sqrt(rvar + eps)
    bias = beta + (b - rmean) * scale      # additive conv bias commutes with max-pool
    # (Cout,Cin,3,3) -> (Cout, ky, kx, ci) -> (Cout, 9*Cin), matching the patch K ordering;
    # zero-pad K to a bf16 sublane multiple (16) so patch loads are full-tile/unmasked.
    K = 9 * cin
    Kp = ((K + 15) // 16) * 16
    w_t = jnp.transpose(w, (0, 2, 3, 1)).reshape(cout, K)
    w_t = jnp.pad(w_t, ((0, 0), (0, Kp - K))).astype(compute_dtype)
    return (w_t, scale.reshape(cout, 1), bias.reshape(cout, 1))


if __name__ == "__main__":
    key = jax.random.PRNGKey(0)
    B, Cin, Cout, H, W = 2, 4, 8, 16, 16
    params = init_params(key, Cin, Cout)
    x = jax.random.normal(jax.random.fold_in(key, 123), (B, Cin, H, W), jnp.float32)

    y = jax.jit(single_conv_pool)(x, params)
    jax.block_until_ready(y)
    assert y.shape == (B, Cout, H // 2, W // 2) and y.dtype == jnp.float32
    print("KERNEL_OK")
</pallas_src>

<mosaic_0001>
module attributes {stable_mosaic.version = 11 : i64} {
  func.func @_conv_pool_bn_relu_kernel(%arg0: memref<48x512xbf16, #tpu.memory_space<vmem>>, %arg1: memref<8x48xbf16, #tpu.memory_space<vmem>>, %arg2: memref<8x128xf32, #tpu.memory_space<vmem>>, %arg3: memref<8x128xf32, #tpu.memory_space<vmem>>, %arg4: memref<8x128xf32, #tpu.memory_space<vmem>>) attributes {dimension_semantics = [], scalar_prefetch = 0 : i64, scratch_operands = 0 : i64, tpu.core_type = #tpu.core_type<tc>} {
    %c0 = arith.constant 0 : index
    %c0_0 = arith.constant 0 : index
    %0 = vector.load %arg1[%c0, %c0_0] : memref<8x48xbf16, #tpu.memory_space<vmem>>, vector<8x48xbf16>
    %c0_1 = arith.constant 0 : index
    %c0_2 = arith.constant 0 : index
    %1 = vector.load %arg0[%c0_1, %c0_2] : memref<48x512xbf16, #tpu.memory_space<vmem>>, vector<48x512xbf16>
    %cst = arith.constant dense<0.000000e+00> : vector<8x512xf32>
    %2 = tpu.matmul %0, %1, %cst {dimension_numbers = #tpu.dot_dimension_numbers<[1], [0], [0], [1], [0, 0, 1, 1], [], []>} : vector<8x48xbf16>, vector<48x512xbf16>, vector<8x512xf32> -> vector<8x512xf32>
    %3 = vector.extract_strided_slice %2 {offsets = [0, 0], sizes = [8, 128], strides = [1, 1]} : vector<8x512xf32> to vector<8x128xf32>
    %4 = vector.extract_strided_slice %2 {offsets = [0, 128], sizes = [8, 128], strides = [1, 1]} : vector<8x512xf32> to vector<8x128xf32>
    %5 = arith.maximumf %3, %4 : vector<8x128xf32>
    %6 = vector.extract_strided_slice %2 {offsets = [0, 256], sizes = [8, 128], strides = [1, 1]} : vector<8x512xf32> to vector<8x128xf32>
    %7 = vector.extract_strided_slice %2 {offsets = [0, 384], sizes = [8, 128], strides = [1, 1]} : vector<8x512xf32> to vector<8x128xf32>
    %8 = arith.maximumf %6, %7 : vector<8x128xf32>
    %9 = arith.maximumf %5, %8 : vector<8x128xf32>
    %c0_3 = arith.constant 0 : index
    %c0_4 = arith.constant 0 : index
    %10 = vector.load %arg2[%c0_3, %c0_4] : memref<8x128xf32, #tpu.memory_space<vmem>>, vector<8x128xf32>
    %11 = arith.mulf %9, %10 : vector<8x128xf32>
    %c0_5 = arith.constant 0 : index
    %c0_6 = arith.constant 0 : index
    %12 = vector.load %arg3[%c0_5, %c0_6] : memref<8x128xf32, #tpu.memory_space<vmem>>, vector<8x128xf32>
    %13 = arith.addf %11, %12 : vector<8x128xf32>
    %cst_7 = arith.constant 0.000000e+00 : f32
    %14 = vector.broadcast %cst_7 : f32 to vector<8x128xf32>
    %15 = arith.maximumf %13, %14 : vector<8x128xf32>
    %c0_8 = arith.constant 0 : index
    %c0_9 = arith.constant 0 : index
    %16 = vector.load %arg4[%c0_8, %c0_9] : memref<8x128xf32, #tpu.memory_space<vmem>>, vector<8x128xf32>
    tpu.vector_store %arg4[%c0_8, %c0_9], %15 {strides = array<i32>} : memref<8x128xf32, #tpu.memory_space<vmem>>, vector<8x128xf32>,
    return
  }
}

</mosaic_0001>

<bundles_post_ra>
// kernel: single_conv_pool.1
= control target key start
LH: loop header
LB: loop body
LE: loop exit
PB: predicated region body
PF: predicated region fallthrough
CT: control target
= control target key end

     0   :  { %v223_v1 = vmov 0   ;;  %vm91_vm0 = vcmask 392192   ;;  %s297_s0 = inlined_call_operand.vmem [shape: bf16[48,512], index: 0, kind: input, shape index: {}]   ;;  %s298_s1 = inlined_call_operand.vmem [shape: bf16[8,48], index: 1, kind: input, shape index: {}]   ;;  %s299_s2 = inlined_call_operand.vmem [shape: f32[8,128], index: 2, kind: input, shape index: {}]   ;;  %s300_s3 = inlined_call_operand.vmem [shape: f32[8,128], index: 3, kind: input, shape index: {}]   ;;  %s301_s4 = inlined_call_operand.vmem [shape: f32[8,128], index: 4, kind: output, shape index: {}]  }
   0x1   :  { %v205_v0 = vld [vmem:[%s297_s0 + $0x44] ss:$16 sps:$4 sm:$0xff]   ;;  %127 = vmatprep.mubr.bf16.mxu0 %v223_v1  ;;  %168 = vmatprep.mubr.bf16.mxu1 %v223_v1  ;;  %v207_v2 = vld [vmem:[%s297_s0 + $0x4c] ss:$16 sps:$4 sm:$0xff]   ;;  %v209_v3 = vld [vmem:[%s297_s0 + $0x40] ss:$16 sps:$4 sm:$0xff]  }
   0x2   :  { %105 = vmatprep.subr.bf16.mxu0 %v205_v0  ;;  %v210_v4 = vld [vmem:[%s297_s0 + $0x48] ss:$16 sps:$4 sm:$0xff]   ;;  %146 = vmatprep.subr.bf16.mxu1 %v207_v2  ;;  %v211_v5 = vld [vmem:[%s297_s0 + $0x24] ss:$16 sps:$4 sm:$0xff]   ;;  %v213_v6 = vld [vmem:[%s297_s0 + $0x2c] ss:$16 sps:$4 sm:$0xff]  }
   0x3   :  { %106 = vmatpush1.bf16.msra.mxu0 %v209_v3  ;;  %147 = vmatpush1.bf16.msra.mxu1 %v210_v4  ;;  %v215_v7 = vld [vmem:[%s297_s0 + $0x20] ss:$16 sps:$4 sm:$0xff]   ;;  %v216_v8 = vld [vmem:[%s297_s0 + $0x28] ss:$16 sps:$4 sm:$0xff]   ;;  %v217_v9 = vld [vmem:[%s297_s0 + $0x4] ss:$16 sps:$4 sm:$0xff]  }
   0x4   :  { %107 = vmatprep.subr.bf16.mxu0 %v211_v5  ;;  %148 = vmatprep.subr.bf16.mxu1 %v213_v6  ;;  %v219_v10 = vld [vmem:[%s297_s0 + $0xc] ss:$16 sps:$4 sm:$0xff]   ;;  %v221_v11 = vld [vmem:[%s297_s0] ss:$16 sps:$4 sm:$0xff]   ;;  %v222_v12 = vld [vmem:[%s297_s0 + $0x8] ss:$16 sps:$4 sm:$0xff]  }
   0x5   :  { %v18_v13 = vld [vmem:[%s298_s1] sm:$0xf] }
   0x6   :  { %v180_v20 = vld [vmem:[%s299_s2] sm:$0xff] }
   0x7   :  { %108 = vmatpush1.bf16.msra.mxu0 %v215_v7  ;;  %149 = vmatpush1.bf16.msra.mxu1 %v216_v8  ;;  %v182_v24 = vld [vmem:[%s300_s3] sm:$0xff] }
   0x8   :  { %109 = vmatprep.subr.bf16.mxu0 %v217_v9  ;;  %150 = vmatprep.subr.bf16.mxu1 %v219_v10 }
   0xb   :  { %110 = vmatpush1.bf16.msra.mxu0 %v221_v11  ;;  %151 = vmatpush1.bf16.msra.mxu1 %v222_v12 }
   0xe   :  { %202 = vmatmul.mubr.msk.bf16.vlgmr.msra.gmra.mxu0 %vm91_vm0, %v18_v13  ;;  %203 = vmatmul.mubr.msk.bf16.vlgmr.msra.gmra.mxu1 %vm91_vm0, %v18_v13 }
  0xce   :  { %v129_v14 = vpop.f32.mrf.mxu0  ;;  %v170_v15 = vpop.f32.mrf.mxu1 }
  0xd0   :  { %v131_v16 = vpop.f32.mrf.mxu0  ;;  %v172_v17 = vpop.f32.mrf.mxu1 }
  0xd1   :  { %v177_v18 = vmax.f32 %v129_v14, %v131_v16  ;;  %v178_v19 = vmax.f32 %v170_v15, %v172_v17 }
  0xd2   :  { %v133_v21 = vpop.f32.mrf.mxu0  ;;  %v174_v22 = vpop.f32.mrf.mxu1 }
  0xd3   :  { %v179_v23 = vmax.f32 %v177_v18, %v178_v19 }
  0xd4   :  { %v134_v25 = vpop.f32.mrf.mxu0  ;;  %v175_v26 = vpop.f32.mrf.mxu1 }
  0xd5   :  { %v181_v27 = vmul.f32 %v180_v20, %v179_v23 }
  0xd7   :  { %v183_v28 = vadd.f32 %v182_v24, %v181_v27 }
  0xd9   :  { %v184_v29 = vmax.f32 %v183_v28, 0.0 }
  0xdb   :  { %185 = vst [vmem:[%s301_s4] sm:$0xff] %v184_v29 }

</bundles_post_ra>
